<compile_context>
chip_gen: v7x
topology: tpu7x:2x2x1
jax: 0.10.0
libtpu: 0.0.40
codegen_flags: <defaults>
</compile_context>

<pallas_src>
import functools
import math

import jax
import jax.numpy as jnp
from jax.experimental import pallas as pl
from jax.experimental.pallas import tpu as pltpu


def _patch_merge_kernel(xa_ref, xb_ref, wa_ref, wb_ref, b_ref, o_ref, *,
                        eps, four_c):
    # xa_ref / xb_ref: (tg, W/2, 2C) tiles with the even-h / odd-h image rows
    #   of the current group of merged patches.  Along the last axis:
    #     [..., :C]  -> w-even channels (x0 for xa, x1 for xb)
    #     [..., C:]  -> w-odd  channels (x2 for xa, x3 for xb)
    # wa_ref / wb_ref: (2C, 2Cout) weight slices (LayerNorm gamma folded in),
    #   rows permuted to match the feature order of xa / xb.
    # b_ref: (1, 2Cout) == beta @ W_reduction^T.
    # o_ref: (tg * W/2, 2Cout)
    tg, wh, k = xa_ref.shape
    rows = tg * wh
    xa = xa_ref[...].astype(jnp.float32).reshape(rows, k)
    xb = xb_ref[...].astype(jnp.float32).reshape(rows, k)

    # LayerNorm statistics over the full 4C features (split across xa / xb).
    inv_n = 1.0 / four_c
    mean = (jnp.sum(xa, axis=-1, keepdims=True)
            + jnp.sum(xb, axis=-1, keepdims=True)) * inv_n
    ca = xa - mean
    cb = xb - mean
    var = (jnp.sum(ca * ca, axis=-1, keepdims=True)
           + jnp.sum(cb * cb, axis=-1, keepdims=True)) * inv_n
    inv = jax.lax.rsqrt(var + eps)

    # Reduction Linear(4C -> 2Cout) as two MXU matmuls accumulated in f32
    # (gamma already folded into the weights, beta into the bias).
    mm_dtype = wa_ref.dtype
    y = jnp.dot((ca * inv).astype(mm_dtype), wa_ref[...],
                preferred_element_type=jnp.float32)
    y = y + jnp.dot((cb * inv).astype(mm_dtype), wb_ref[...],
                    preferred_element_type=jnp.float32)
    y = y + b_ref[...]
    o_ref[...] = y.astype(o_ref.dtype)


def prepare_params(params, *, compute_dtype=jnp.bfloat16):
    """One-time parameter prep (keep OUT of the per-call path).

    Folds the LayerNorm affine into the reduction weight / a bias, transposes
    the PyTorch (out, in) weight, and regroups its rows from the torch concat
    order [x0; x1; x2; x3] into the per-h-parity order used by the kernel:
      xa (even image rows): [x0 ; x2],   xb (odd image rows): [x1 ; x3].
    """
    gamma = params["gamma"].astype(jnp.float32)        # (4C,)
    beta = params["beta"].astype(jnp.float32)          # (4C,)
    w = params["w_reduction"].astype(jnp.float32)      # (2Cout, 4C) torch (out, in)
    c = gamma.shape[0] // 4
    w_prime = w.T * gamma[:, None]                     # (4C, 2Cout), gamma folded
    b_prime = beta[None, :] @ w.T                      # (1, 2Cout), beta folded
    w_a = jnp.concatenate([w_prime[0:c], w_prime[2 * c:3 * c]], axis=0)
    w_b = jnp.concatenate([w_prime[c:2 * c], w_prime[3 * c:4 * c]], axis=0)
    return {
        "w_a": w_a.astype(compute_dtype),
        "w_b": w_b.astype(compute_dtype),
        "b": b_prime.astype(jnp.float32),
    }


def _vmem_budget_bytes():
    """~75% of physical VMEM: ~96MiB on v5e/v6e (128MiB), ~48MiB on v7x (64MiB)."""
    try:
        cap = pltpu.get_tpu_info().vmem_capacity_bytes
    except Exception:  # conservative fallback that fits every generation
        cap = 64 * 1024 * 1024
    return min(int(cap) * 3 // 4, 100 * 1024 * 1024)


def patch_merging_forward(x, act_scaling_factor, prepared, input_resolution, *,
                          eps=1e-5, tile_rows=None, out_dtype=None,
                          vmem_limit_bytes=None, single_buffer_params=False):
    """x: (B, H*W, C). Returns (y, act_scaling_factor), y: (B, H*W//4, 2C)."""
    H, W = input_resolution
    B, L, C = x.shape
    assert L == H * W, "input feature has wrong size"
    assert H % 2 == 0 and W % 2 == 0, f"x size ({H}*{W}) are not even."

    Wh = W // 2
    G = B * (H // 2)          # merged-h row groups
    M = G * Wh                # total merged patches
    Cout = prepared["w_a"].shape[-1]    # == 2*C
    out_dtype = x.dtype if out_dtype is None else out_dtype

    # Free (bitcast) view: (B, H*W, C) -> (G, 2, W/2, 2C).
    #   axis 1: image-row parity (0 even / 1 odd), last axis: [w-even | w-odd] channels.
    # The patch-merge gather happens inside the kernel via the two in_specs below,
    # so the (M, 4C) rearranged tensor is never written to / re-read from HBM.
    x6 = x.reshape(G, 2, Wh, 2 * C)

    if vmem_limit_bytes is None:
        vmem_limit_bytes = _vmem_budget_bytes()
    if tile_rows is None:
        # larger blocks amortize the ~0.35us per-grid-step overhead (v5e/v6e);
        # v7x (64MiB physical VMEM) stays at 512.
        tile_rows = 1024 if vmem_limit_bytes >= 80 * 1024 * 1024 else 512

    # Rows of the G axis per grid step.
    tg = max(1, min(G, tile_rows // max(1, Wh)))
    if G >= 2:                          # >=2 grid steps so both TCs get work (v7x)
        tg = min(tg, -(-G // 2))
    step = 8 // math.gcd(Wh, 8)         # keep output block rows % 8 == 0
    if tg < G:
        tg = min(G, max(step, (tg // step) * step))
    rows_per_step = tg * Wh
    grid = (pl.cdiv(G, tg),)

    w_a, w_b, bias = prepared["w_a"], prepared["w_b"], prepared["b"]

    def _const_spec(shape):
        kw = {}
        if single_buffer_params:
            # Grid-resident blocks: skip double-buffering to reclaim VMEM (v7x).
            kw["pipeline_mode"] = pl.Buffered(1)
        return pl.BlockSpec(shape, lambda i: (0,) * len(shape), **kw)

    def _isz(dt):
        return jnp.dtype(dt).itemsize

    cost = pl.CostEstimate(
        flops=2 * M * (4 * C) * Cout + 10 * M * 4 * C,
        transcendentals=M,
        bytes_accessed=(x6.size * _isz(x6.dtype) + w_a.size * _isz(w_a.dtype)
                        + w_b.size * _isz(w_b.dtype) + bias.size * _isz(bias.dtype)
                        + M * Cout * _isz(out_dtype)),
    )

    kernel = functools.partial(_patch_merge_kernel, eps=eps, four_c=float(4 * C))
    y = pl.pallas_call(
        kernel,
        out_shape=jax.ShapeDtypeStruct((M, Cout), out_dtype),
        grid_spec=pltpu.PrefetchScalarGridSpec(
            num_scalar_prefetch=0,
            grid=grid,
            in_specs=[
                pl.BlockSpec((tg, None, Wh, 2 * C), lambda i: (i, 0, 0, 0)),  # even h
                pl.BlockSpec((tg, None, Wh, 2 * C), lambda i: (i, 1, 0, 0)),  # odd h
                _const_spec((2 * C, Cout)),
                _const_spec((2 * C, Cout)),
                _const_spec((1, Cout)),
            ],
            out_specs=pl.BlockSpec((rows_per_step, Cout), lambda i: (i, 0)),
        ),
        compiler_params=pltpu.CompilerParams(
            dimension_semantics=("parallel",),
            vmem_limit_bytes=vmem_limit_bytes,
        ),
        cost_estimate=cost,
    )(x6, x6, w_a, w_b, bias)

    y = y.reshape(B, (H // 2) * Wh, Cout)
    # TODO(synk): QuantAct / QuantLinear re-quantization not reproducible here;
    # the scaling factor is passed through unchanged (float value path only).
    return y, act_scaling_factor


def init_params(key, dim):
    """Parameters matching the module's shapes (non-trivial affine so the
    gamma/beta fold is actually exercised)."""
    k_w, k_g, k_b = jax.random.split(key, 3)
    gamma = 1.0 + 0.1 * jax.random.normal(k_g, (4 * dim,), jnp.float32)
    beta = 0.05 * jax.random.normal(k_b, (4 * dim,), jnp.float32)
    bound = 1.0 / jnp.sqrt(4.0 * dim)
    w_reduction = jax.random.uniform(
        k_w, (2 * dim, 4 * dim), jnp.float32, minval=-bound, maxval=bound)
    return {"gamma": gamma, "beta": beta, "w_reduction": w_reduction}


def reference_forward(x, act_scaling_factor, params, input_resolution, eps=1e-5):
    """Pure-JAX f32 reference (mirrors the torch value path)."""
    H, W = input_resolution
    B, L, C = x.shape
    xr = x.astype(jnp.float32).reshape(B, H, W, C)
    xm = jnp.concatenate(
        [xr[:, 0::2, 0::2, :], xr[:, 1::2, 0::2, :],
         xr[:, 0::2, 1::2, :], xr[:, 1::2, 1::2, :]], axis=-1)
    xm = xm.reshape(B, -1, 4 * C)
    mean = jnp.mean(xm, axis=-1, keepdims=True)
    var = jnp.mean((xm - mean) ** 2, axis=-1, keepdims=True)
    xn = (xm - mean) * jax.lax.rsqrt(var + eps)
    xn = xn * params["gamma"] + params["beta"]
    y = jnp.einsum("blk,ok->blo", xn, params["w_reduction"])
    return y, act_scaling_factor


if __name__ == "__main__":
    # Small shapes consistent with the module: B=2, H=W=8, dim=32.
    B, H, W, dim = 2, 8, 8, 32
    key = jax.random.PRNGKey(0)
    k_x, k_p = jax.random.split(key)

    # bf16 activations in/out (the kernel is HBM-bandwidth-bound; LN stats in f32).
    x = jax.random.normal(k_x, (B, H * W, dim), jnp.float32).astype(jnp.bfloat16)
    act_scaling_factor = jnp.float32(1.0)
    params = init_params(k_p, dim)
    prepared = prepare_params(params)        # one-time prep, out of the call path

    fwd = jax.jit(functools.partial(patch_merging_forward,
                                    input_resolution=(H, W)))
    y, sf = fwd(x, act_scaling_factor, prepared)
    y = jax.block_until_ready(y)

    y_ref, _ = reference_forward(x, act_scaling_factor, params, (H, W))
    assert y.shape == (B, (H // 2) * (W // 2), 2 * dim), y.shape
    err = float(jnp.max(jnp.abs(y.astype(jnp.float32) - y_ref)))
    assert err < 5e-2, f"mismatch vs reference, max abs err = {err}"

    print("KERNEL_OK")
</pallas_src>

<mosaic_0001>
module attributes {stable_mosaic.version = 11 : i64} {
  func.func @_patch_merge_kernel(%arg0: i32, %arg1: memref<4x1x4x64xbf16, #tpu.memory_space<vmem>>, %arg2: memref<4x1x4x64xbf16, #tpu.memory_space<vmem>>, %arg3: memref<64x64xbf16, #tpu.memory_space<vmem>>, %arg4: memref<64x64xbf16, #tpu.memory_space<vmem>>, %arg5: memref<1x64xf32, #tpu.memory_space<vmem>>, %arg6: memref<16x64xbf16, #tpu.memory_space<vmem>>) attributes {dimension_semantics = [#tpu.dimension_semantics<parallel>], iteration_bounds = array<i64: 2>, scalar_prefetch = 0 : i64, scratch_operands = 0 : i64, tpu.core_type = #tpu.core_type<tc>, window_params = [{transform_indices = @transform_0, window_bounds = array<i64: 4, 1, 4, 64>}, {transform_indices = @transform_1, window_bounds = array<i64: 4, 1, 4, 64>}, {pipeline_mode = #tpu.pipeline_mode<synchronous>, transform_indices = @transform_2, window_bounds = array<i64: 64, 64>}, {pipeline_mode = #tpu.pipeline_mode<synchronous>, transform_indices = @transform_3, window_bounds = array<i64: 64, 64>}, {pipeline_mode = #tpu.pipeline_mode<synchronous>, transform_indices = @transform_4, window_bounds = array<i64: 1, 64>}, {transform_indices = @transform_5, window_bounds = array<i64: 16, 64>}]} {
    %c0 = arith.constant 0 : index
    %c0_0 = arith.constant 0 : index
    %c0_1 = arith.constant 0 : index
    %c0_2 = arith.constant 0 : index
    %0 = vector.load %arg1[%c0, %c0_0, %c0_1, %c0_2] : memref<4x1x4x64xbf16, #tpu.memory_space<vmem>>, vector<4x1x4x64xbf16>
    %1 = vector.shape_cast %0 : vector<4x1x4x64xbf16> to vector<4x4x64xbf16>
    %2 = arith.extf %1 : vector<4x4x64xbf16> to vector<4x4x64xf32>
    %3 = vector.shape_cast %2 : vector<4x4x64xf32> to vector<16x64xf32>
    %c0_3 = arith.constant 0 : index
    %c0_4 = arith.constant 0 : index
    %c0_5 = arith.constant 0 : index
    %c0_6 = arith.constant 0 : index
    %4 = vector.load %arg2[%c0_3, %c0_4, %c0_5, %c0_6] : memref<4x1x4x64xbf16, #tpu.memory_space<vmem>>, vector<4x1x4x64xbf16>
    %5 = vector.shape_cast %4 : vector<4x1x4x64xbf16> to vector<4x4x64xbf16>
    %6 = arith.extf %5 : vector<4x4x64xbf16> to vector<4x4x64xf32>
    %7 = vector.shape_cast %6 : vector<4x4x64xf32> to vector<16x64xf32>
    %cst = arith.constant dense<0.000000e+00> : vector<16xf32>
    %8 = vector.multi_reduction <add>, %3, %cst [1] : vector<16x64xf32> to vector<16xf32>
    %9 = vector.shape_cast %8 : vector<16xf32> to vector<16x1xf32>
    %cst_7 = arith.constant dense<0.000000e+00> : vector<16xf32>
    %10 = vector.multi_reduction <add>, %7, %cst_7 [1] : vector<16x64xf32> to vector<16xf32>
    %11 = vector.shape_cast %10 : vector<16xf32> to vector<16x1xf32>
    %12 = arith.addf %9, %11 : vector<16x1xf32>
    %cst_8 = arith.constant 7.812500e-03 : f32
    %13 = vector.broadcast %cst_8 : f32 to vector<16x1xf32>
    %14 = arith.mulf %12, %13 : vector<16x1xf32>
    %15 = vector.broadcast %14 : vector<16x1xf32> to vector<16x64xf32>
    %16 = arith.subf %3, %15 : vector<16x64xf32>
    %17 = vector.broadcast %14 : vector<16x1xf32> to vector<16x64xf32>
    %18 = arith.subf %7, %17 : vector<16x64xf32>
    %19 = arith.mulf %16, %16 : vector<16x64xf32>
    %cst_9 = arith.constant dense<0.000000e+00> : vector<16xf32>
    %20 = vector.multi_reduction <add>, %19, %cst_9 [1] : vector<16x64xf32> to vector<16xf32>
    %21 = vector.shape_cast %20 : vector<16xf32> to vector<16x1xf32>
    %22 = arith.mulf %18, %18 : vector<16x64xf32>
    %cst_10 = arith.constant dense<0.000000e+00> : vector<16xf32>
    %23 = vector.multi_reduction <add>, %22, %cst_10 [1] : vector<16x64xf32> to vector<16xf32>
    %24 = vector.shape_cast %23 : vector<16xf32> to vector<16x1xf32>
    %25 = arith.addf %21, %24 : vector<16x1xf32>
    %cst_11 = arith.constant 7.812500e-03 : f32
    %26 = vector.broadcast %cst_11 : f32 to vector<16x1xf32>
    %27 = arith.mulf %25, %26 : vector<16x1xf32>
    %cst_12 = arith.constant 9.99999974E-6 : f32
    %28 = vector.broadcast %cst_12 : f32 to vector<16x1xf32>
    %29 = arith.addf %27, %28 : vector<16x1xf32>
    %30 = math.rsqrt %29 : vector<16x1xf32>
    %31 = vector.broadcast %30 : vector<16x1xf32> to vector<16x64xf32>
    %32 = arith.mulf %16, %31 : vector<16x64xf32>
    %33 = arith.truncf %32 : vector<16x64xf32> to vector<16x64xbf16>
    %c0_13 = arith.constant 0 : index
    %c0_14 = arith.constant 0 : index
    %34 = vector.load %arg3[%c0_13, %c0_14] : memref<64x64xbf16, #tpu.memory_space<vmem>>, vector<64x64xbf16>
    %cst_15 = arith.constant dense<0.000000e+00> : vector<16x64xf32>
    %35 = tpu.matmul %33, %34, %cst_15 {dimension_numbers = #tpu.dot_dimension_numbers<[1], [0], [0], [1], [0, 0, 1, 1], [], []>} : vector<16x64xbf16>, vector<64x64xbf16>, vector<16x64xf32> -> vector<16x64xf32>
    %36 = vector.broadcast %30 : vector<16x1xf32> to vector<16x64xf32>
    %37 = arith.mulf %18, %36 : vector<16x64xf32>
    %38 = arith.truncf %37 : vector<16x64xf32> to vector<16x64xbf16>
    %c0_16 = arith.constant 0 : index
    %c0_17 = arith.constant 0 : index
    %39 = vector.load %arg4[%c0_16, %c0_17] : memref<64x64xbf16, #tpu.memory_space<vmem>>, vector<64x64xbf16>
    %cst_18 = arith.constant dense<0.000000e+00> : vector<16x64xf32>
    %40 = tpu.matmul %38, %39, %cst_18 {dimension_numbers = #tpu.dot_dimension_numbers<[1], [0], [0], [1], [0, 0, 1, 1], [], []>} : vector<16x64xbf16>, vector<64x64xbf16>, vector<16x64xf32> -> vector<16x64xf32>
    %41 = arith.addf %35, %40 : vector<16x64xf32>
    %c0_19 = arith.constant 0 : index
    %c0_20 = arith.constant 0 : index
    %42 = vector.load %arg5[%c0_19, %c0_20] : memref<1x64xf32, #tpu.memory_space<vmem>>, vector<1x64xf32>
    %43 = vector.broadcast %42 : vector<1x64xf32> to vector<16x64xf32>
    %44 = arith.addf %41, %43 : vector<16x64xf32>
    %45 = arith.truncf %44 : vector<16x64xf32> to vector<16x64xbf16>
    %c0_21 = arith.constant 0 : index
    %c0_22 = arith.constant 0 : index
    %46 = vector.load %arg6[%c0_21, %c0_22] : memref<16x64xbf16, #tpu.memory_space<vmem>>, vector<16x64xbf16>
    tpu.vector_store %arg6[%c0_21, %c0_22], %45 {strides = array<i32>} : memref<16x64xbf16, #tpu.memory_space<vmem>>, vector<16x64xbf16>,
    return
  }
  func.func @transform_0(%arg0: i32) -> (i32, i32, i32, i32) {
    %c0_i32 = arith.constant 0 : i32
    %c0_i32_0 = arith.constant 0 : i32
    %c0_i32_1 = arith.constant 0 : i32
    %c0_i32_2 = arith.constant 0 : i32
    return %arg0, %c0_i32, %c0_i32_0, %c0_i32_1 : i32, i32, i32, i32
  }
  func.func @transform_1(%arg0: i32) -> (i32, i32, i32, i32) {
    %c1_i32 = arith.constant 1 : i32
    %c0_i32 = arith.constant 0 : i32
    %c0_i32_0 = arith.constant 0 : i32
    %c0_i32_1 = arith.constant 0 : i32
    return %arg0, %c1_i32, %c0_i32, %c0_i32_0 : i32, i32, i32, i32
  }
  func.func @transform_2(%arg0: i32) -> (i32, i32) {
    %c0_i32 = arith.constant 0 : i32
    %c0_i32_0 = arith.constant 0 : i32
    %c0_i32_1 = arith.constant 0 : i32
    return %c0_i32, %c0_i32_0 : i32, i32
  }
  func.func @transform_3(%arg0: i32) -> (i32, i32) {
    %c0_i32 = arith.constant 0 : i32
    %c0_i32_0 = arith.constant 0 : i32
    %c0_i32_1 = arith.constant 0 : i32
    return %c0_i32, %c0_i32_0 : i32, i32
  }
  func.func @transform_4(%arg0: i32) -> (i32, i32) {
    %c0_i32 = arith.constant 0 : i32
    %c0_i32_0 = arith.constant 0 : i32
    %c0_i32_1 = arith.constant 0 : i32
    return %c0_i32, %c0_i32_0 : i32, i32
  }
  func.func @transform_5(%arg0: i32) -> (i32, i32) {
    %c0_i32 = arith.constant 0 : i32
    %c0_i32_0 = arith.constant 0 : i32
    return %arg0, %c0_i32 : i32, i32
  }
}

</mosaic_0001>

<bundles_post_ra>
// kernel: patch_merging_forward.1
= control target key start
LH: loop header
LB: loop body
LE: loop exit
PB: predicated region body
PF: predicated region fallthrough
CT: control target
= control target key end

     0   :  { %10 = vsyncpa [#allocation5], 0  ;;  %s1280_s0 = inlined_call_operand.vmem [shape: bf16[8,2,4,64], index: 0, kind: input, shape index: {}, may-alias: {0,1}]   ;;  %s1281_s1 = inlined_call_operand.vmem [shape: bf16[8,2,4,64], index: 1, kind: input, shape index: {}, may-alias: {0,1}]   ;;  %s1282_s2 = inlined_call_operand.vmem [shape: bf16[64,64], index: 2, kind: input, shape index: {}]   ;;  %s1283_s3 = inlined_call_operand.vmem [shape: bf16[64,64], index: 3, kind: input, shape index: {}]   ;;  %s1284_s4 = inlined_call_operand.vmem [shape: f32[1,64], index: 4, kind: input, shape index: {}]   ;;  %s1285_s5 = inlined_call_operand.hbm [shape: bf16[32,64], index: 5, kind: output, shape index: {}]  }
   0x1   :  { %12 = vsyncpa [#allocation5 + $0x1], 0  ;;  %s1061_s18 = smov 0   ;;  %s1063_s19 = smov 0  }
   0x2   :  { %s1065_s20 = smov 0   ;;  %s1067_s21 = smov 0  }
   0x3 LB: > { %s826_s22 = sadd.s32 4294967295, %s1022_s21   ;;  %s827_s23 = sadd.s32 4294967294, %s1022_s21   ;;  %s1022_s21 = sphi %s1067_s21, %s1292_s21   ;;  %s1018_s20 = sphi %s1065_s20, %s1291_s20   ;;  %s1014_s19 = sphi %s1063_s19, %s1290_s19   ;;  %s1010_s18 = sphi %s1061_s18, %s1289_s18  }
   0x4   : > { %s1084_s24 = sadd.s32 1, %s1022_s21   ;;  %s25_s25 = sadd.s32 1, %s1018_s20 }
   0x5   : > { %s22_s26 = ssub.s32 %s1022_s21, %s1084_s24  ;;  %p32_p0 = scmp.ne.s32.totalorder %s1018_s20, %s1014_s19 }
   0x6   : > { %p23_p1 = scmp.eq.s32.totalorder %s22_s26, 0  ;;  %p33_p2 = scmp.eq.s32.totalorder %s1022_s21, 0 }
   0x7   : > { %p151_p3 = scmp.eq.s32.totalorder %s826_s22, 1  ;;  %p156_p4 = scmp.ne.s32.totalorder %s1014_s19, %s1010_s18 }
   0x8   : > { %s1097_s27 = scalar_select %p23_p1, %s1018_s20, %s25_s25  }
   0x9   : > { %p1099_p5 = por %p33_p2, %p32_p0  ;;  %p1103_p6 = por %p151_p3, %p32_p0 }
   0xa   : > { %p157_p7 = scmp.eq.s32.totalorder %s827_s23, 1  ;;  %p829_p9 = scmp.ge.s32.totalorder %s1022_s21, 2 }
   0xc   : > { %p1107_p8 = por %p157_p7, %p156_p4  ;;  %182 = sbr.rel (%p829_p9) target bundleno = 33 (0x21), region = 28 }
  0x13   : > { %185 = sbr.rel (!%p1099_p5) target bundleno = 26 (0x1a), region = 32  ;;  %s187_s6 = sand.u32 (%p1099_p5), 1, %s1018_s20  }
  0x14   : > { %s864_s7 = sshll.u32 (%p1099_p5), %s1022_s21, 4  ;;  %s830_s8 = sshll.u32 (%p1099_p5), %s187_s6, 3 }
  0x15   : > { %s193_s11 = scalar_lea.vmem (%p1099_p5), %s1280_s0, %s864_s7  ;;  %s189_s12 = scalar_lea.vmem (%p1099_p5), [#allocation2], %s830_s8 }
  0x16   : > { %v209_v0 = vld [vmem:[%s193_s11] sm:$0x3] (%p1099_p5)  ;;  %v211_v1 = vld [vmem:[%s193_s11 + $0x4] sm:$0x3] (%p1099_p5)  ;;  %v213_v2 = vld [vmem:[%s193_s11 + $0x8] sm:$0x3] (%p1099_p5) }
  0x17   : > { %210 = vst [vmem:[%s189_s12] sm:$0x3] (%p1099_p5), %v209_v0  ;;  %212 = vst [vmem:[%s189_s12 + $0x2] sm:$0x3] (%p1099_p5), %v211_v1  ;;  %v215_v3 = vld [vmem:[%s193_s11 + $0xc] sm:$0x3] (%p1099_p5) }
  0x18   : > { %214 = vst [vmem:[%s189_s12 + $0x4] sm:$0x3] (%p1099_p5), %v213_v2  ;;  %216 = vst [vmem:[%s189_s12 + $0x6] sm:$0x3] (%p1099_p5), %v215_v3 }
  0x1a PF: > { %247 = sbr.rel (!%p1099_p5) target bundleno = 33 (0x21), region = 73  ;;  %s249_s13 = sand.u32 (%p1099_p5), 1, %s1018_s20  }
  0x1b   : > { %s865_s14 = sshll.u32 (%p1099_p5), %s1022_s21, 4  ;;  %s834_s15 = sshll.u32 (%p1099_p5), %s249_s13, 3 }
  0x1c   : > { %s771_s23 = scalar_lea.vmem (%p1099_p5), %s1281_s1, %s865_s14  ;;  %s251_s25 = scalar_lea.vmem (%p1099_p5), [#allocation3], %s834_s15 }
  0x1d   : > { %v837_v4 = vld [vmem:[%s771_s23 + $0x2] sm:$0x3] (%p1099_p5)  ;;  %v838_v5 = vld [vmem:[%s771_s23 + $0x6] sm:$0x3] (%p1099_p5)  ;;  %v839_v6 = vld [vmem:[%s771_s23 + $0xa] sm:$0x3] (%p1099_p5) }
  0x1e   : > { %273 = vst [vmem:[%s251_s25] sm:$0x3] (%p1099_p5), %v837_v4  ;;  %275 = vst [vmem:[%s251_s25 + $0x2] sm:$0x3] (%p1099_p5), %v838_v5  ;;  %v840_v7 = vld [vmem:[%s771_s23 + $0xe] sm:$0x3] (%p1099_p5) }
  0x1f   : > { %277 = vst [vmem:[%s251_s25 + $0x4] sm:$0x3] (%p1099_p5), %v839_v6  ;;  %279 = vst [vmem:[%s251_s25 + $0x6] sm:$0x3] (%p1099_p5), %v840_v7 }
  0x21 PF: > { %p841_p10 = scmp.ge.s32.totalorder %s1022_s21, 1  ;;  %p309_p11 = scmp.lt.s32.totalorder %s1022_s21, 3 }
  0x23   : > { %p310_p12 = pnand %p841_p10, %p309_p11 }
  0x24   : > { %s316_s26 = sand.u32 (!%p310_p12), 1, %s1014_s19   ;;  %vm382_vm0 = vcmask (!%p310_p12), 523264   ;;  %v1024_v32 = vmov (!%p310_p12), 839922192   ;;  %v412_v34 = vlaneseq (!%p310_p12)  ;;  %v1025_v35 = vmov (!%p310_p12), 1985246804  }
  0x25   : > { %313 = sbr.rel (%p310_p12) target bundleno = 612 (0x264), region = 114  ;;  %s1133_s28 = sshll.u32 (!%p310_p12), %s316_s26, 3  ;;  %v410_v33 = vunpack.c.l.s4 (!%p310_p12), %v1024_v32  ;;  %v417_v36 = vunpack.c.l.s4 (!%p310_p12), %v1025_v35  ;;  %vm1027_vm1 = vmmov (!%p310_p12), 0   ;;  %vm722_vm2 = vcmask (!%p310_p12), 519168  }
  0x26   : > { %s325_s6 = scalar_lea.vmem (!%p310_p12), [#allocation3], %s1133_s28  ;;  %s318_s7 = scalar_lea.vmem (!%p310_p12), [#allocation2], %s1133_s28  ;;  %v413_v38 = vshrl.u32 (!%p310_p12), %v412_v34, 7 }
  0x27   : > { %v366_v8 = vld [vmem:[%s325_s6] sm:$0x3] (!%p310_p12)  ;;  %v367_v9 = vld [vmem:[%s325_s6 + $0x2] sm:$0x3] (!%p310_p12)  ;;  %v358_v10 = vld [vmem:[%s318_s7] sm:$0x3] (!%p310_p12)  ;;  %v411_v37 = vunpack.c.0.s8 (!%p310_p12), %v410_v33  ;;  %v418_v39 = vunpack.c.0.s8 (!%p310_p12), %v417_v36 }
  0x28   : > { %v370_v11 = vunpack.c.l.bf16 (!%p310_p12), %v366_v8  ;;  %v371_v12 = vunpack.c.l.bf16 (!%p310_p12), %v367_v9  ;;  %v359_v13 = vld [vmem:[%s318_s7 + $0x2] sm:$0x3] (!%p310_p12)  ;;  %v362_v14 = vunpack.c.l.bf16 (!%p310_p12), %v358_v10  ;;  %v368_v15 = vld [vmem:[%s325_s6 + $0x4] sm:$0x3] (!%p310_p12)  ;;  %v369_v16 = vld [vmem:[%s325_s6 + $0x6] sm:$0x3] (!%p310_p12) }
  0x29   : > { %v363_v17 = vunpack.c.l.bf16 (!%p310_p12), %v359_v13  ;;  %v372_v18 = vunpack.c.l.bf16 (!%p310_p12), %v368_v15  ;;  %v373_v19 = vunpack.c.l.bf16 (!%p310_p12), %v369_v16  ;;  %v360_v20 = vld [vmem:[%s318_s7 + $0x4] sm:$0x3] (!%p310_p12)  ;;  %v361_v21 = vld [vmem:[%s318_s7 + $0x6] sm:$0x3] (!%p310_p12)  ;;  %v1141_v42 = vsub.s32 (!%p310_p12), %v411_v37, %v413_v38  ;;  %s868_s12 = sshll.u32 (!%p310_p12), %s826_s22, 7  ;;  %s353_s13 = scalar_lea.vmem (!%p310_p12), [#allocation4], %s1133_s28 }
  0x2a   : > { %v393_v22 = vcombine.low (!%p310_p12), %v370_v11, %v371_v12  ;;  %v364_v23 = vunpack.c.l.bf16 (!%p310_p12), %v360_v20  ;;  %v365_v24 = vunpack.c.l.bf16 (!%p310_p12), %v361_v21  ;;  %v1143_v43 = vsub.s32 (!%p310_p12), %v418_v39, %v413_v38  ;;  %v949_v15 = vld [vmem:[%s1282_s2] sm:$0xff] (!%p310_p12)   ;;  %v953_v20 = vld [vmem:[%s1282_s2 + $0x10] sm:$0xff] (!%p310_p12)   ;;  %v954_v21 = vld [vmem:[%s1283_s3 + $0x18] sm:$0xff] (!%p310_p12)   ;;  %s739_s14 = sshll.u32 (!%p310_p12), %s353_s13, 4  ;;  %s1232_s17 = scalar_lea.hbm (!%p310_p12), %s1285_s5, %s868_s12  ;;  %s1234_s14 = int_to_ptr.vmem [resolvable:$true] %s739_s14 }
  0x2b   : > { %v378_v25 = vcombine.low (!%p310_p12), %v362_v14, %v363_v17  ;;  %v394_v26 = vcombine.low (!%p310_p12), %v372_v18, %v373_v19  ;;  %v1026_v16 = vmov (!%p310_p12), 0.0   ;;  %s1238_s22 = scalar_lea.sflag (!%p310_p12), [#allocation5], %s316_s26  ;;  %s960_s28 = scalar_lea.vmem (!%p310_p12), %s1234_s14, 128 }
  0x2c   : > { %v397_v27 = vsel %vm382_vm0, %v393_v22, 0.0  ;;  %v379_v28 = vcombine.low %v364_v23, %v365_v24  ;;  %879 = vmatprep.subr.bf16.mxu0 %v1026_v16  ;;  %891 = vmatprep.subr.bf16.mxu1 %v1026_v16  ;;  %v955_v22 = vld [vmem:[%s1282_s2 + $0x18] sm:$0xff]   ;;  %p961_p13 = scmp.ne.s32.totalorder %s1234_s14, %s960_s28  ;;  %s1028_s23 = smov [#allocation4]  }
  0x2d   : > { %398 = vadd.xlane.f32.xlu1 %v397_v27  ;;  %v383_v29 = vsel %vm382_vm0, %v378_v25, 0.0  ;;  %v400_v30 = vsel %vm382_vm0, %v394_v26, 0.0  ;;  %892 = vmatpush3.bf16.msra.mxu1 %v949_v15  ;;  %s964_s25 = sshll.u32 %s1028_s23, 4  ;;  %s965_s25 = int_to_ptr.vmem [resolvable:$false] %s964_s25 }
  0x2e   : > { %384 = vadd.xlane.f32.xlu0 %v383_v29  ;;  %v386_v31 = vsel %vm382_vm0, %v379_v28, 0.0  ;;  %893 = vmatprep.subr.bf16.mxu1 %v1026_v16  ;;  %p962_p0 = pnand %p961_p13, %p1103_p6  ;;  %s966_s6 = scalar_lea.vmem %s965_s25, 256 }
  0x2f   : > { %887 = vmatprep.mubr.msk.bf16.mxu0 %vm1027_vm1, %v1026_v16  ;;  %899 = vmatprep.mubr.msk.bf16.mxu1 %vm1027_vm1, %v1026_v16  ;;  %p967_p2 = scmp.lt.s32.totalorder %s1234_s14, %s965_s25  ;;  %p968_p3 = scmp.lt.s32.totalorder %s966_s6, %s960_s28 }
  0x30   : > { %p963_p1 = pneg %p962_p0 }
  0x31   : > { %401 = vadd.xlane.f32.xlu1 %v400_v30  ;;  %p969_p4 = por %p968_p3, %p967_p2 }
  0x32   : > { %387 = vadd.xlane.f32.xlu0 %v386_v31 }
  0x33   : > { %p970_p5 = pnand %p969_p4, %p963_p1 }
  0xba   : > { %v399_v40 = vpop.xlane.xlu1 %398 }
  0xbb   : > { %v385_v41 = vpop.xlane.xlu0 %384 }
  0xbc   : > { %v403_v44 = vadd.f32 %v399_v40, %v385_v41 }
  0xbe   : > { %v405_v45 = vmul.f32 0.0078125, %v403_v44  ;;  %v402_v46 = vpop.xlane.xlu1 %401 }
  0xbf   : > { %v388_v47 = vpop.xlane.xlu0 %387 }
  0xc0   : > { %v415_v48 = vrot.slane %v405_v45, %v1141_v42  ;;  %v422_v49 = vrot.slane %v405_v45, %v1143_v43  ;;  %v404_v50 = vadd.f32 %v402_v46, %v388_v47 }
  0xc2   : > { %v1147_v51 = vsub.f32 %v362_v14, %v415_v48  ;;  %v1149_v52 = vsub.f32 %v363_v17, %v422_v49  ;;  %v1151_v53 = vsub.f32 %v370_v11, %v415_v48  ;;  %v1153_v54 = vsub.f32 %v371_v12, %v422_v49  ;;  %v948_v14 = vld [vmem:[%s1283_s3] sm:$0xff]   ;;  %v950_v17 = vld [vmem:[%s1283_s3 + $0x8] sm:$0xff]  }
  0xc3   : > { %v406_v55 = vmul.f32 0.0078125, %v404_v50  ;;  %880 = vmatpush3.bf16.msra.mxu0 %v948_v14 }
  0xc4   : > { %v449_v56 = vmul.f32 %v1147_v51, %v1147_v51  ;;  %v450_v57 = vmul.f32 %v1149_v52, %v1149_v52  ;;  %v467_v58 = vmul.f32 %v1151_v53, %v1151_v53  ;;  %v468_v59 = vmul.f32 %v1153_v54, %v1153_v54  ;;  %881 = vmatprep.subr.bf16.mxu0 %v1026_v16 }
  0xc5   : > { %v429_v60 = vrot.slane %v406_v55, %v1141_v42  ;;  %v436_v61 = vrot.slane %v406_v55, %v1143_v43 }
  0xc6   : > { %v457_v62 = vcombine.low %v449_v56, %v450_v57  ;;  %v475_v4 = vcombine.low %v467_v58, %v468_v59 }
  0xc7   : > { %v1165_v63 = vsub.f32 %v364_v23, %v429_v60  ;;  %v1167_v0 = vsub.f32 %v365_v24, %v436_v61  ;;  %v1169_v1 = vsub.f32 %v372_v18, %v429_v60  ;;  %v1171_v2 = vsub.f32 %v373_v19, %v436_v61  ;;  %v951_v18 = vld [vmem:[%s1282_s2 + $0x8] sm:$0xff]   ;;  %882 = vmatpush3.bf16.msra.mxu0 %v950_v17  ;;  %v952_v19 = vld [vmem:[%s1283_s3 + $0x10] sm:$0xff]  }
  0xc8   : > { %v461_v3 = vsel %vm382_vm0, %v457_v62, 0.0  ;;  %v479_v10 = vsel %vm382_vm0, %v475_v4, 0.0  ;;  %894 = vmatpush3.bf16.msra.mxu1 %v951_v18  ;;  %883 = vmatprep.subr.bf16.mxu0 %v1026_v16 }
  0xc9   : > { %462 = vadd.xlane.f32.xlu0 %v461_v3  ;;  %v451_v5 = vmul.f32 %v1165_v63, %v1165_v63  ;;  %v452_v6 = vmul.f32 %v1167_v0, %v1167_v0  ;;  %v469_v7 = vmul.f32 %v1169_v1, %v1169_v1  ;;  %v470_v8 = vmul.f32 %v1171_v2, %v1171_v2 }
  0xca   : > { %895 = vmatprep.subr.bf16.mxu1 %v1026_v16 }
  0xcb   : > { %v458_v9 = vcombine.low %v451_v5, %v452_v6  ;;  %v476_v12 = vcombine.low %v469_v7, %v470_v8  ;;  %884 = vmatpush3.bf16.msra.mxu0 %v952_v19 }
  0xcc   : > { %896 = vmatpush3.bf16.msra.mxu1 %v953_v20  ;;  %885 = vmatprep.subr.bf16.mxu0 %v1026_v16 }
  0xcd   : > { %480 = vadd.xlane.f32.xlu0 %v479_v10  ;;  %v464_v11 = vsel %vm382_vm0, %v458_v9, 0.0  ;;  %v482_v13 = vsel %vm382_vm0, %v476_v12, 0.0  ;;  %897 = vmatprep.subr.bf16.mxu1 %v1026_v16 }
  0xce   : > { %465 = vadd.xlane.f32.xlu1 %v464_v11 }
  0xcf   : > { %886 = vmatpush3.bf16.msra.mxu0 %v954_v21 }
  0xd0   : > { %898 = vmatpush3.bf16.msra.mxu1 %v955_v22 }
  0xd2   : > { %483 = vadd.xlane.f32.xlu1 %v482_v13 }
 0x156   : > { %v463_v23 = vpop.xlane.xlu0 %462 }
 0x15a   : > { %v481_v24 = vpop.xlane.xlu0 %480 }
 0x15b   : > { %v466_v25 = vpop.xlane.xlu1 %465  ;;  %v485_v26 = vadd.f32 %v481_v24, %v463_v23 }
 0x15d   : > { %v487_v27 = vmul.f32 0.0078125, %v485_v26 }
 0x15f   : > { %v489_v28 = vadd.f32 1e-05, %v487_v27  ;;  %v484_v29 = vpop.xlane.xlu1 %483 }
 0x160   : > { %v486_v30 = vadd.f32 %v484_v29, %v466_v25 }
 0x161   : > { %956 = vrsqrt.f32 %v489_v28 }
 0x162   : > { %v488_v31 = vmul.f32 0.0078125, %v486_v30 }
 0x164   : > { %v490_v32 = vadd.f32 1e-05, %v488_v31 }
 0x166   : > { %958 = vrsqrt.f32 %v490_v32 }
 0x16b   : > { %v957_v33 = vpop.eup %956 }
 0x16c   : > { %v501_v34 = vrot.slane %v957_v33, %v1141_v42  ;;  %v508_v35 = vrot.slane %v957_v33, %v1143_v43 }
 0x16e   : > { %v548_v37 = vmul.f32 %v501_v34, %v1151_v53  ;;  %v549_v38 = vmul.f32 %v508_v35, %v1153_v54  ;;  %v527_v41 = vmul.f32 %v501_v34, %v1147_v51  ;;  %v528_v44 = vmul.f32 %v508_v35, %v1149_v52  ;;  %v855_v52 = vld [vmem:[%s1284_s4] ss:$0 sm:$0xff] }
 0x170   : > { %v959_v36 = vpop.eup %958  ;;  %v556_v49 = vcombine.low %v548_v37, %v549_v38  ;;  %v535_v53 = vcombine.low %v527_v41, %v528_v44 }
 0x171   : > { %v515_v39 = vrot.slane %v959_v36, %v1141_v42  ;;  %v522_v40 = vrot.slane %v959_v36, %v1143_v43 }
 0x173   : > { %v550_v45 = vmul.f32 %v515_v39, %v1169_v1  ;;  %v551_v46 = vmul.f32 %v522_v40, %v1171_v2  ;;  %v529_v47 = vmul.f32 %v515_v39, %v1165_v63  ;;  %v530_v48 = vmul.f32 %v522_v40, %v1167_v0 }
 0x175   : > { %v557_v50 = vcombine.low %v550_v45, %v551_v46  ;;  %v536_v54 = vcombine.low %v529_v47, %v530_v48 }
 0x177   : > { %v560_v55 = vpack.c.bf16 %v557_v50, %v556_v49  ;;  %v539_v42 = vpack.c.bf16 %v536_v54, %v535_v53 }
 0x179   : > { %888 = vmatmul.mubr.msk.bf16.vlgmr.msra.gmra.mrb[0].mxu0 %vm382_vm0, %v560_v55  ;;  %900 = vmatmul.mubr.msk.bf16.vlgmr.msra.gmra.mrb[0].mxu1 %vm382_vm0, %v539_v42 }
 0x24c   : > { %v630_v43 = vpop.f32.mrb[0].mxu0  ;;  %v698_v51 = vpop.f32.mrb[0].mxu1 }
 0x24d   : > { %v699_v56 = vadd.f32 %v698_v51, %v630_v43  ;;  %v889_v57 = vpop.f32.mrb[1].mxu0  ;;  %v901_v58 = vpop.f32.mrb[1].mxu1 }
 0x24e   : > { %v633_v59 = vpop.f32.mrb[2].mxu0  ;;  %v701_v60 = vpop.f32.mrb[2].mxu1 }
 0x24f   : > { %v712_v61 = vadd.f32 %v855_v52, %v699_v56  ;;  %v702_v62 = vadd.f32 %v701_v60, %v633_v59  ;;  %v890_v63 = vpop.f32.mrb[3].mxu0  ;;  %v902_v0 = vpop.f32.mrb[3].mxu1 }
 0x251   : > { %v866_v1 = vpack.c.bf16 %v712_v61, %v712_v61  ;;  %v713_v2 = vadd.f32 %v855_v52, %v702_v62 }
 0x253   : > { %723 = vst.msk [vmem:[%s353_s13] sm:$0xf] %vm722_vm2, %v866_v1  ;;  %v867_v3 = vpack.c.bf16 %v713_v2, %v713_v2 }
 0x255   : > { %724 = vst.msk [vmem:[%s353_s13 + $0x4] sm:$0xf] %vm722_vm2, %v867_v3 }
 0x256   : > { %973 = shalt.err (!%p970_p5)
}
 0x257   : > { %s974_s26 = scalar_lea.hbm %s1232_s17, 128  ;;  %s978_s9 = scalar_lea.hbm %s1285_s5, 256 }
 0x258   : > { %p975_p7 = scmp.ne.s32.totalorder %s1232_s17, %s974_s26  ;;  %p979_p12 = scmp.lt.u32.totalorder %s1232_s17, %s1285_s5 }
 0x259   : > { %p980_p13 = scmp.lt.u32.totalorder %s978_s9, %s974_s26  ;;  %p982_p1 = scmp.lt.u32.totalorder %s974_s26, %s1232_s17 }
 0x25a   : > { %p976_p10 = pnand %p975_p7, %p1103_p6 }
 0x25b   : > { %p981_p0 = por %p980_p13, %p979_p12 }
 0x25c   : > { %p977_p11 = pneg %p976_p10 }
 0x25d   : > { %p983_p2 = por %p982_p1, %p981_p0 }
 0x25f   : > { %p984_p3 = pnand %p983_p2, %p977_p11 }
 0x261   : > { %987 = shalt.err (!%p984_p3)
}
 0x262   : > { %s1029_s12 = smov 64   ;;  %s1030_s13 = smov 4  }
 0x263   : > { %903 = dma.vmem_to_hbm [thread:$0]  (%p1103_p6), %s1234_s14, 128, %s1232_s17, %s1238_s22, %s1029_s12, %s1029_s12, %s1030_s13  }
 0x264 PF: > { %s754_s15 = sand.u32 1, %s1010_s18   ;;  %p906_p4 = pnand %p829_p9, %p1107_p8 }
 0x265   : > { %s755_s16 = scalar_lea.sflag [#allocation5], %s754_s15 }
 0x266   : > { %1005 = dma.done.wait (!%p906_p4), %s755_s16, 128  }
 0x267   : > { %1007 = vsyncadd (!%p906_p4), %s755_s16, 4294967168  ;;  %p15_p5 = scmp.ge.s32.totalorder %s1084_s24, 4   ;;  %s1289_s18 = smov %s1014_s19 }
 0x268   : > { %s1290_s19 = smov %s1018_s20  ;;  %s1291_s20 = smov %s1097_s27 }
 0x269   : > { %s1292_s21 = smov %s1084_s24  ;;  %17 = sbr.rel (!%p15_p5) target bundleno = 3 (0x3), region = 170 }
 0x270   :  { %760 = vsyncpa [#allocation5], 1 }
 0x271   :  { %762 = vsyncpa [#allocation5 + $0x1], 1 }

</bundles_post_ra>
